<compile_context>
chip_gen: v5e
topology: v5e:2x2
jax: 0.10.0
libtpu: 0.0.40
codegen_flags: <defaults>
</compile_context>

<pallas_src>
import math

import jax
import jax.numpy as jnp
from jax.experimental import pallas as pl
from jax.experimental.pallas import tpu as pltpu

_PACK = 16        # logical rows packed per lane-dense row; _PACK*w is a multiple of 128 for w % 8 == 0
_ROW_TILE = 8192  # logical rows per grid step (review: 4096-8192); packed tile = _ROW_TILE // _PACK


# ------------------------------ small helpers ------------------------------- #

def _round_up(x, m):
    return ((x + m - 1) // m) * m


def _pack_rows(x, p=_PACK):
    """[R, c] -> [R//p, p*c] (pure row-major view; lane-dense)."""
    r, c = x.shape
    return x.reshape(r // p, p * c)


def _block_diag(w, p=_PACK):
    """kron(I_p, w): [k, n] -> [p*k, p*n]; keeps packed rows independent under one dense matmul."""
    return jnp.kron(jnp.eye(p, dtype=w.dtype), w)


def _packed_tile(rows_packed, row_tile):
    """Packed-row tile: multiple of 16 (f32/bf16 safe) or the full extent for small inputs."""
    max_packed = max(16, (row_tile // _PACK) // 16 * 16)
    return rows_packed if rows_packed <= max_packed else max_packed


# ------------------------------ Pallas kernel -------------------------------- #

def _fused_linear_tanh(inputs, weights, bias, out_dtype, row_tile=_ROW_TILE):
    """out = tanh(sum_i inputs[i] @ weights[i] + bias); row-tiled, lane-dense packed layout.

    inputs[i]:  [R_pk, Ki]  row-streamed (double-buffered) blocks
    weights[i]: [Ki, W]     grid-invariant (block-diagonal packed) weights
    bias:       [1, W]      f32
    """
    rows = inputs[0].shape[0]
    width = bias.shape[1]
    tile = _packed_tile(rows, row_tile)
    n_terms = len(inputs)

    def kernel(*refs):
        x_refs = refs[:n_terms]
        w_refs = refs[n_terms:2 * n_terms]
        b_ref = refs[2 * n_terms]
        o_ref = refs[2 * n_terms + 1]
        y = jnp.dot(x_refs[0][...], w_refs[0][...], preferred_element_type=jnp.float32)
        for x_ref, w_ref in zip(x_refs[1:], w_refs[1:]):
            y = y + jnp.dot(x_ref[...], w_ref[...], preferred_element_type=jnp.float32)
        o_ref[...] = jnp.tanh(y + b_ref[...]).astype(o_ref.dtype)

    in_specs = [pl.BlockSpec((tile, x.shape[1]), lambda i: (i, 0)) for x in inputs]
    in_specs += [pl.BlockSpec(w.shape, lambda i: (0, 0)) for w in weights]
    in_specs += [pl.BlockSpec((1, width), lambda i: (0, 0))]
    # TODO(synk): if a profile shows exposed DMA, add pipeline_mode=pl.Buffered(3) to the
    #             row-streamed in_specs above.

    return pl.pallas_call(
        kernel,
        out_shape=jax.ShapeDtypeStruct((rows, width), out_dtype),
        grid=(pl.cdiv(rows, tile),),
        in_specs=in_specs,
        out_specs=pl.BlockSpec((tile, width), lambda i: (i, 0)),
        compiler_params=pltpu.CompilerParams(dimension_semantics=("parallel",)),
    )(*inputs, *weights, bias)


# --------------------------- topology preprocessing --------------------------- #

def preprocess_graph(src, dst, n_nodes):
    """Topology-only precompute, hoisted out of the per-layer/per-step forward:
       destination-sorted edge order (for the sorted segment reduction), inverse in-degree,
       and pad-to-_PACK index vectors used by the packed lane-dense layout."""
    src = jnp.asarray(src, jnp.int32)
    dst = jnp.asarray(dst, jnp.int32)
    n_edges = src.shape[0]
    e_pad = _round_up(max(n_edges, 1), _PACK)
    n_pad = _round_up(max(n_nodes, 1), _PACK)

    order = jnp.argsort(dst).astype(jnp.int32)      # stable sort by destination (CSR order)
    dst_sorted = dst[order]
    deg = jax.ops.segment_sum(jnp.ones((n_edges,), jnp.float32), dst_sorted,
                              num_segments=n_pad, indices_are_sorted=True)
    inv_deg = (1.0 / jnp.maximum(deg, 1.0))[:, None]            # [N_pad, 1]; deg==0 -> neigh 0 (DGL)

    pad_e = e_pad - n_edges
    zpad = jnp.zeros((pad_e,), jnp.int32)
    src_pad = jnp.concatenate([src, zpad]) if pad_e else src
    dst_pad = jnp.concatenate([dst, zpad]) if pad_e else dst
    return {"src_pad": src_pad, "dst_pad": dst_pad, "order": order,
            "dst_sorted": dst_sorted, "inv_deg": inv_deg}


# ---------------------------------- forward ----------------------------------- #

def esage_conv_forward(feat, edge_feat, graph, params, *,
                       activation_dtype=jnp.float32, row_tile=_ROW_TILE):
    """ESAGEConv forward for a single edge-type graph.

    feat:      [N, n_in]   node features (f32)
    edge_feat: [E, e_in]   edge features (f32)
    graph:     output of preprocess_graph(src, dst, N)   (hoisted, per-topology)
    returns (h_new [N, n_out] f32, e_new [E, e_out] f32)
    """
    P = _PACK
    act = activation_dtype
    n_nodes, n_in = feat.shape
    n_edges, e_in = edge_feat.shape
    n_out = params["msg_b"].shape[-1]
    e_out = params["edge_b"].shape[-1]
    e_pad = graph["src_pad"].shape[0]
    n_pad = graph["inv_deg"].shape[0]

    # --- pack weights into block-diagonal, lane-dense form (tiny; MXU has huge slack here) ---
    w_msg, w_node, w_edge = params["msg_w"], params["node_w"], params["edge_w"]
    wm_h = _block_diag(w_msg[:n_in].astype(act), P)
    wm_e = _block_diag(w_msg[n_in:].astype(act), P)
    wn_n = _block_diag(w_node[:n_out].astype(act), P)
    wn_f = _block_diag(w_node[n_out:].astype(act), P)
    we_s = _block_diag(w_edge[:n_in].astype(act), P)
    we_n = _block_diag(w_edge[n_in:n_in + n_out].astype(act), P)
    we_e = _block_diag(w_edge[n_in + n_out:].astype(act), P)
    b_msg = jnp.tile(params["msg_b"].astype(jnp.float32), (1, P))
    b_node = jnp.tile(params["node_b"].astype(jnp.float32), (1, P))
    b_edge = jnp.tile(params["edge_b"].astype(jnp.float32), (1, P))

    # --- gathers (index vectors precomputed per-topology; no E-sized concat / tile-sized pads) ---
    feat_act = feat.astype(act)
    h_src = jnp.take(feat_act, graph["src_pad"], axis=0)        # [E_pad, n_in] (pad rows via index 0)
    ef = edge_feat.astype(act)
    if e_pad != n_edges:                                        # <=15-row pad; absent if E % 16 == 0
        ef = jnp.pad(ef, ((0, e_pad - n_edges), (0, 0)))
    feat_pad = feat_act
    if n_pad != n_nodes:                                        # <=15-row pad; absent if N % 16 == 0
        feat_pad = jnp.pad(feat_pad, ((0, n_pad - n_nodes), (0, 0)))

    # 1) per-edge message: m = tanh(h_src @ Wh + e @ We + b)   (no xcat materialization)
    m_pk = _fused_linear_tanh([_pack_rows(h_src, P), _pack_rows(ef, P)],
                              [wm_h, wm_e], b_msg, act, row_tile)
    m = m_pk.reshape(e_pad, n_out)                              # free row-major unpack

    # 2) mean aggregation: destination-sorted segment sum (f32), mean folded via inv_deg
    m_sorted = jnp.take(m, graph["order"], axis=0).astype(jnp.float32)   # also drops pad rows
    seg = jax.ops.segment_sum(m_sorted, graph["dst_sorted"],
                              num_segments=n_pad, indices_are_sorted=True)
    neigh = seg * graph["inv_deg"]                              # [N_pad, n_out]; deg==0 -> 0 (DGL)
    # TODO(synk): fuse this reduction into the message kernel with PrefetchScalarGridSpec CSR
    #             offsets so m never round-trips HBM (MoE group-offset pattern).

    # 3) node update: h_new = tanh(neigh @ Wn + feat @ Wf + b)  (dropout = identity in eval)
    h_new_pk = _fused_linear_tanh([_pack_rows(neigh.astype(act), P), _pack_rows(feat_pad, P)],
                                  [wn_n, wn_f], b_node, jnp.float32, row_tile)
    h_new_pad = h_new_pk.reshape(n_pad, n_out)
    h_new = h_new_pad[:n_nodes]

    # 4) edge update: e_new = tanh(h_src @ Ws + h_new[dst] @ Wn + e @ We + b)
    neigh_dst = jnp.take(h_new_pad.astype(act), graph["dst_pad"], axis=0)   # [E_pad, n_out]
    # TODO(synk): profile-gated: keep h_new_pad VMEM-resident and gather in-kernel instead of
    #             materializing neigh_dst in HBM (watch the 64 MiB VMEM budget on v7x).
    e_new_pk = _fused_linear_tanh(
        [_pack_rows(h_src, P), _pack_rows(neigh_dst, P), _pack_rows(ef, P)],
        [we_s, we_n, we_e], b_edge, jnp.float32, row_tile)
    e_new = e_new_pk.reshape(e_pad, e_out)[:n_edges]

    return h_new, e_new


# ------------------------------ parameter init -------------------------------- #

def _xavier_normal(key, fan_in, fan_out):
    std = math.sqrt(2.0 / (fan_in + fan_out))
    # stored transposed relative to nn.Linear.weight: shape [fan_in, fan_out]
    return std * jax.random.normal(key, (fan_in, fan_out), jnp.float32)


def _linear_bias(key, fan_in, fan_out):
    bound = 1.0 / math.sqrt(fan_in)
    return jax.random.uniform(key, (1, fan_out), jnp.float32, -bound, bound)


def init_esage_params(key, n_in, e_in, n_out, e_out):
    ks = jax.random.split(key, 6)
    return {
        "msg_w": _xavier_normal(ks[0], n_in + e_in, n_out),
        "msg_b": _linear_bias(ks[1], n_in + e_in, n_out),
        "node_w": _xavier_normal(ks[2], n_in + n_out, n_out),
        "node_b": _linear_bias(ks[3], n_in + n_out, n_out),
        "edge_w": _xavier_normal(ks[4], n_in + n_out + e_in, e_out),
        "edge_b": _linear_bias(ks[5], n_in + n_out + e_in, e_out),
    }


# --------------------------------- reference ----------------------------------- #

def _reference_forward(feat, edge_feat, src, dst, params):
    """Pure-jnp reference mirroring the PyTorch/DGL semantics (eval mode)."""
    n_nodes = feat.shape[0]
    h_src = feat[src]
    m = jnp.tanh(jnp.concatenate([h_src, edge_feat], 1) @ params["msg_w"] + params["msg_b"])
    n_out = m.shape[1]
    seg = jnp.zeros((n_nodes, n_out), jnp.float32).at[dst].add(m)
    deg = jnp.zeros((n_nodes,), jnp.float32).at[dst].add(1.0)
    neigh = seg / jnp.maximum(deg, 1.0)[:, None]
    h_new = jnp.tanh(jnp.concatenate([neigh, feat], 1) @ params["node_w"] + params["node_b"])
    e_new = jnp.tanh(jnp.concatenate([h_src, h_new[dst], edge_feat], 1) @ params["edge_w"]
                     + params["edge_b"])
    return h_new, e_new


# ----------------------------------- demo --------------------------------------- #

if __name__ == "__main__":
    N_NODES, N_EDGES = 30, 50          # deliberately not multiples of 16 (exercise padding path)
    N_IN, E_IN, N_OUT, E_OUT = 8, 8, 16, 16

    key = jax.random.PRNGKey(0)
    k_feat, k_edge, k_src, k_dst, k_param = jax.random.split(key, 5)

    feat = jax.random.normal(k_feat, (N_NODES, N_IN), jnp.float32)
    edge_feat = jax.random.normal(k_edge, (N_EDGES, E_IN), jnp.float32)
    src = jax.random.randint(k_src, (N_EDGES,), 0, N_NODES, jnp.int32)
    dst = jax.random.randint(k_dst, (N_EDGES,), 0, N_NODES, jnp.int32)
    params = init_esage_params(k_param, N_IN, E_IN, N_OUT, E_OUT)

    graph = preprocess_graph(src, dst, N_NODES)     # hoisted: per-topology, not per-step

    fwd = jax.jit(esage_conv_forward, static_argnames=("activation_dtype", "row_tile"))

    h_new, e_new = fwd(feat, edge_feat, graph, params)
    jax.block_until_ready((h_new, e_new))

    assert h_new.shape == (N_NODES, N_OUT)
    assert e_new.shape == (N_EDGES, E_OUT)
    assert bool(jnp.all(jnp.isfinite(h_new))) and bool(jnp.all(jnp.isfinite(e_new)))

    h_ref, e_ref = _reference_forward(feat, edge_feat, src, dst, params)
    assert bool(jnp.allclose(h_new, h_ref, atol=1e-5, rtol=1e-5))
    assert bool(jnp.allclose(e_new, e_ref, atol=1e-5, rtol=1e-5))

    # bf16-streamed variant: halves the bytes of the E-sized slabs; segment accumulation stays f32.
    h_bf, e_bf = fwd(feat, edge_feat, graph, params, activation_dtype=jnp.bfloat16)
    jax.block_until_ready((h_bf, e_bf))
    assert bool(jnp.all(jnp.isfinite(h_bf))) and bool(jnp.all(jnp.isfinite(e_bf)))
    assert bool(jnp.allclose(h_bf, h_ref, atol=2e-1))
    assert bool(jnp.allclose(e_bf, e_ref, atol=2e-1))

    print("KERNEL_OK")
</pallas_src>

<mosaic_0001>
module attributes {stable_mosaic.version = 11 : i64} {
  func.func @kernel(%arg0: i32, %arg1: memref<4x128xf32, #tpu.memory_space<vmem>>, %arg2: memref<4x128xf32, #tpu.memory_space<vmem>>, %arg3: memref<128x256xf32, #tpu.memory_space<vmem>>, %arg4: memref<128x256xf32, #tpu.memory_space<vmem>>, %arg5: memref<1x256xf32, #tpu.memory_space<vmem>>, %arg6: memref<4x256xf32, #tpu.memory_space<vmem>>) attributes {dimension_semantics = [#tpu.dimension_semantics<parallel>], iteration_bounds = array<i64: 1>, scalar_prefetch = 0 : i64, scratch_operands = 0 : i64, tpu.core_type = #tpu.core_type<tc>, window_params = [{transform_indices = @transform_0, window_bounds = array<i64: 4, 128>}, {transform_indices = @transform_1, window_bounds = array<i64: 4, 128>}, {pipeline_mode = #tpu.pipeline_mode<synchronous>, transform_indices = @transform_2, window_bounds = array<i64: 128, 256>}, {pipeline_mode = #tpu.pipeline_mode<synchronous>, transform_indices = @transform_3, window_bounds = array<i64: 128, 256>}, {pipeline_mode = #tpu.pipeline_mode<synchronous>, transform_indices = @transform_4, window_bounds = array<i64: 1, 256>}, {transform_indices = @transform_5, window_bounds = array<i64: 4, 256>}]} {
    %c0 = arith.constant 0 : index
    %c0_0 = arith.constant 0 : index
    %0 = vector.load %arg1[%c0, %c0_0] : memref<4x128xf32, #tpu.memory_space<vmem>>, vector<4x128xf32>
    %c0_1 = arith.constant 0 : index
    %c0_2 = arith.constant 0 : index
    %1 = vector.load %arg3[%c0_1, %c0_2] : memref<128x256xf32, #tpu.memory_space<vmem>>, vector<128x256xf32>
    %cst = arith.constant dense<0.000000e+00> : vector<4x256xf32>
    %2 = tpu.matmul %0, %1, %cst {dimension_numbers = #tpu.dot_dimension_numbers<[1], [0], [0], [1], [0, 0, 1, 1], [], []>} : vector<4x128xf32>, vector<128x256xf32>, vector<4x256xf32> -> vector<4x256xf32>
    %c0_3 = arith.constant 0 : index
    %c0_4 = arith.constant 0 : index
    %3 = vector.load %arg2[%c0_3, %c0_4] : memref<4x128xf32, #tpu.memory_space<vmem>>, vector<4x128xf32>
    %c0_5 = arith.constant 0 : index
    %c0_6 = arith.constant 0 : index
    %4 = vector.load %arg4[%c0_5, %c0_6] : memref<128x256xf32, #tpu.memory_space<vmem>>, vector<128x256xf32>
    %cst_7 = arith.constant dense<0.000000e+00> : vector<4x256xf32>
    %5 = tpu.matmul %3, %4, %cst_7 {dimension_numbers = #tpu.dot_dimension_numbers<[1], [0], [0], [1], [0, 0, 1, 1], [], []>} : vector<4x128xf32>, vector<128x256xf32>, vector<4x256xf32> -> vector<4x256xf32>
    %6 = arith.addf %2, %5 : vector<4x256xf32>
    %c0_8 = arith.constant 0 : index
    %c0_9 = arith.constant 0 : index
    %7 = vector.load %arg5[%c0_8, %c0_9] : memref<1x256xf32, #tpu.memory_space<vmem>>, vector<1x256xf32>
    %8 = vector.broadcast %7 : vector<1x256xf32> to vector<4x256xf32>
    %9 = arith.addf %6, %8 : vector<4x256xf32>
    %10 = math.tanh %9 : vector<4x256xf32>
    %c0_10 = arith.constant 0 : index
    %c0_11 = arith.constant 0 : index
    %11 = vector.load %arg6[%c0_10, %c0_11] : memref<4x256xf32, #tpu.memory_space<vmem>>, vector<4x256xf32>
    tpu.vector_store %arg6[%c0_10, %c0_11], %10 {strides = array<i32>} : memref<4x256xf32, #tpu.memory_space<vmem>>, vector<4x256xf32>,
    return
  }
  func.func @transform_0(%arg0: i32) -> (i32, i32) {
    %c0_i32 = arith.constant 0 : i32
    %c0_i32_0 = arith.constant 0 : i32
    return %arg0, %c0_i32 : i32, i32
  }
  func.func @transform_1(%arg0: i32) -> (i32, i32) {
    %c0_i32 = arith.constant 0 : i32
    %c0_i32_0 = arith.constant 0 : i32
    return %arg0, %c0_i32 : i32, i32
  }
  func.func @transform_2(%arg0: i32) -> (i32, i32) {
    %c0_i32 = arith.constant 0 : i32
    %c0_i32_0 = arith.constant 0 : i32
    %c0_i32_1 = arith.constant 0 : i32
    return %c0_i32, %c0_i32_0 : i32, i32
  }
  func.func @transform_3(%arg0: i32) -> (i32, i32) {
    %c0_i32 = arith.constant 0 : i32
    %c0_i32_0 = arith.constant 0 : i32
    %c0_i32_1 = arith.constant 0 : i32
    return %c0_i32, %c0_i32_0 : i32, i32
  }
  func.func @transform_4(%arg0: i32) -> (i32, i32) {
    %c0_i32 = arith.constant 0 : i32
    %c0_i32_0 = arith.constant 0 : i32
    %c0_i32_1 = arith.constant 0 : i32
    return %c0_i32, %c0_i32_0 : i32, i32
  }
  func.func @transform_5(%arg0: i32) -> (i32, i32) {
    %c0_i32 = arith.constant 0 : i32
    %c0_i32_0 = arith.constant 0 : i32
    return %arg0, %c0_i32 : i32, i32
  }
}

module attributes {stable_mosaic.version = 11 : i64} {
  func.func @kernel(%arg0: i32, %arg1: memref<2x256xf32, #tpu.memory_space<vmem>>, %arg2: memref<2x128xf32, #tpu.memory_space<vmem>>, %arg3: memref<256x256xf32, #tpu.memory_space<vmem>>, %arg4: memref<128x256xf32, #tpu.memory_space<vmem>>, %arg5: memref<1x256xf32, #tpu.memory_space<vmem>>, %arg6: memref<2x256xf32, #tpu.memory_space<vmem>>) attributes {dimension_semantics = [#tpu.dimension_semantics<parallel>], iteration_bounds = array<i64: 1>, scalar_prefetch = 0 : i64, scratch_operands = 0 : i64, tpu.core_type = #tpu.core_type<tc>, window_params = [{transform_indices = @transform_0, window_bounds = array<i64: 2, 256>}, {transform_indices = @transform_1, window_bounds = array<i64: 2, 128>}, {pipeline_mode = #tpu.pipeline_mode<synchronous>, transform_indices = @transform_2, window_bounds = array<i64: 256, 256>}, {pipeline_mode = #tpu.pipeline_mode<synchronous>, transform_indices = @transform_3, window_bounds = array<i64: 128, 256>}, {pipeline_mode = #tpu.pipeline_mode<synchronous>, transform_indices = @transform_4, window_bounds = array<i64: 1, 256>}, {transform_indices = @transform_5, window_bounds = array<i64: 2, 256>}]} {
    %c0 = arith.constant 0 : index
    %c0_0 = arith.constant 0 : index
    %0 = vector.load %arg1[%c0, %c0_0] : memref<2x256xf32, #tpu.memory_space<vmem>>, vector<2x256xf32>
    %c0_1 = arith.constant 0 : index
    %c0_2 = arith.constant 0 : index
    %1 = vector.load %arg3[%c0_1, %c0_2] : memref<256x256xf32, #tpu.memory_space<vmem>>, vector<256x256xf32>
    %cst = arith.constant dense<0.000000e+00> : vector<2x256xf32>
    %2 = tpu.matmul %0, %1, %cst {dimension_numbers = #tpu.dot_dimension_numbers<[1], [0], [0], [1], [0, 0, 1, 1], [], []>} : vector<2x256xf32>, vector<256x256xf32>, vector<2x256xf32> -> vector<2x256xf32>
    %c0_3 = arith.constant 0 : index
    %c0_4 = arith.constant 0 : index
    %3 = vector.load %arg2[%c0_3, %c0_4] : memref<2x128xf32, #tpu.memory_space<vmem>>, vector<2x128xf32>
    %c0_5 = arith.constant 0 : index
    %c0_6 = arith.constant 0 : index
    %4 = vector.load %arg4[%c0_5, %c0_6] : memref<128x256xf32, #tpu.memory_space<vmem>>, vector<128x256xf32>
    %cst_7 = arith.constant dense<0.000000e+00> : vector<2x256xf32>
    %5 = tpu.matmul %3, %4, %cst_7 {dimension_numbers = #tpu.dot_dimension_numbers<[1], [0], [0], [1], [0, 0, 1, 1], [], []>} : vector<2x128xf32>, vector<128x256xf32>, vector<2x256xf32> -> vector<2x256xf32>
    %6 = arith.addf %2, %5 : vector<2x256xf32>
    %c0_8 = arith.constant 0 : index
    %c0_9 = arith.constant 0 : index
    %7 = vector.load %arg5[%c0_8, %c0_9] : memref<1x256xf32, #tpu.memory_space<vmem>>, vector<1x256xf32>
    %8 = vector.broadcast %7 : vector<1x256xf32> to vector<2x256xf32>
    %9 = arith.addf %6, %8 : vector<2x256xf32>
    %10 = math.tanh %9 : vector<2x256xf32>
    %c0_10 = arith.constant 0 : index
    %c0_11 = arith.constant 0 : index
    %11 = vector.load %arg6[%c0_10, %c0_11] : memref<2x256xf32, #tpu.memory_space<vmem>>, vector<2x256xf32>
    tpu.vector_store %arg6[%c0_10, %c0_11], %10 {strides = array<i32>} : memref<2x256xf32, #tpu.memory_space<vmem>>, vector<2x256xf32>,
    return
  }
  func.func @transform_0(%arg0: i32) -> (i32, i32) {
    %c0_i32 = arith.constant 0 : i32
    %c0_i32_0 = arith.constant 0 : i32
    return %arg0, %c0_i32 : i32, i32
  }
  func.func @transform_1(%arg0: i32) -> (i32, i32) {
    %c0_i32 = arith.constant 0 : i32
    %c0_i32_0 = arith.constant 0 : i32
    return %arg0, %c0_i32 : i32, i32
  }
  func.func @transform_2(%arg0: i32) -> (i32, i32) {
    %c0_i32 = arith.constant 0 : i32
    %c0_i32_0 = arith.constant 0 : i32
    %c0_i32_1 = arith.constant 0 : i32
    return %c0_i32, %c0_i32_0 : i32, i32
  }
  func.func @transform_3(%arg0: i32) -> (i32, i32) {
    %c0_i32 = arith.constant 0 : i32
    %c0_i32_0 = arith.constant 0 : i32
    %c0_i32_1 = arith.constant 0 : i32
    return %c0_i32, %c0_i32_0 : i32, i32
  }
  func.func @transform_4(%arg0: i32) -> (i32, i32) {
    %c0_i32 = arith.constant 0 : i32
    %c0_i32_0 = arith.constant 0 : i32
    %c0_i32_1 = arith.constant 0 : i32
    return %c0_i32, %c0_i32_0 : i32, i32
  }
  func.func @transform_5(%arg0: i32) -> (i32, i32) {
    %c0_i32 = arith.constant 0 : i32
    %c0_i32_0 = arith.constant 0 : i32
    return %arg0, %c0_i32 : i32, i32
  }
}

module attributes {stable_mosaic.version = 11 : i64} {
  func.func @kernel(%arg0: i32, %arg1: memref<4x128xf32, #tpu.memory_space<vmem>>, %arg2: memref<4x256xf32, #tpu.memory_space<vmem>>, %arg3: memref<4x128xf32, #tpu.memory_space<vmem>>, %arg4: memref<128x256xf32, #tpu.memory_space<vmem>>, %arg5: memref<256x256xf32, #tpu.memory_space<vmem>>, %arg6: memref<128x256xf32, #tpu.memory_space<vmem>>, %arg7: memref<1x256xf32, #tpu.memory_space<vmem>>, %arg8: memref<4x256xf32, #tpu.memory_space<vmem>>) attributes {dimension_semantics = [#tpu.dimension_semantics<parallel>], iteration_bounds = array<i64: 1>, scalar_prefetch = 0 : i64, scratch_operands = 0 : i64, tpu.core_type = #tpu.core_type<tc>, window_params = [{transform_indices = @transform_0, window_bounds = array<i64: 4, 128>}, {transform_indices = @transform_1, window_bounds = array<i64: 4, 256>}, {transform_indices = @transform_2, window_bounds = array<i64: 4, 128>}, {pipeline_mode = #tpu.pipeline_mode<synchronous>, transform_indices = @transform_3, window_bounds = array<i64: 128, 256>}, {pipeline_mode = #tpu.pipeline_mode<synchronous>, transform_indices = @transform_4, window_bounds = array<i64: 256, 256>}, {pipeline_mode = #tpu.pipeline_mode<synchronous>, transform_indices = @transform_5, window_bounds = array<i64: 128, 256>}, {pipeline_mode = #tpu.pipeline_mode<synchronous>, transform_indices = @transform_6, window_bounds = array<i64: 1, 256>}, {transform_indices = @transform_7, window_bounds = array<i64: 4, 256>}]} {
    %c0 = arith.constant 0 : index
    %c0_0 = arith.constant 0 : index
    %0 = vector.load %arg1[%c0, %c0_0] : memref<4x128xf32, #tpu.memory_space<vmem>>, vector<4x128xf32>
    %c0_1 = arith.constant 0 : index
    %c0_2 = arith.constant 0 : index
    %1 = vector.load %arg4[%c0_1, %c0_2] : memref<128x256xf32, #tpu.memory_space<vmem>>, vector<128x256xf32>
    %cst = arith.constant dense<0.000000e+00> : vector<4x256xf32>
    %2 = tpu.matmul %0, %1, %cst {dimension_numbers = #tpu.dot_dimension_numbers<[1], [0], [0], [1], [0, 0, 1, 1], [], []>} : vector<4x128xf32>, vector<128x256xf32>, vector<4x256xf32> -> vector<4x256xf32>
    %c0_3 = arith.constant 0 : index
    %c0_4 = arith.constant 0 : index
    %3 = vector.load %arg2[%c0_3, %c0_4] : memref<4x256xf32, #tpu.memory_space<vmem>>, vector<4x256xf32>
    %c0_5 = arith.constant 0 : index
    %c0_6 = arith.constant 0 : index
    %4 = vector.load %arg5[%c0_5, %c0_6] : memref<256x256xf32, #tpu.memory_space<vmem>>, vector<256x256xf32>
    %cst_7 = arith.constant dense<0.000000e+00> : vector<4x256xf32>
    %5 = tpu.matmul %3, %4, %cst_7 {dimension_numbers = #tpu.dot_dimension_numbers<[1], [0], [0], [1], [0, 0, 1, 1], [], []>} : vector<4x256xf32>, vector<256x256xf32>, vector<4x256xf32> -> vector<4x256xf32>
    %6 = arith.addf %2, %5 : vector<4x256xf32>
    %c0_8 = arith.constant 0 : index
    %c0_9 = arith.constant 0 : index
    %7 = vector.load %arg3[%c0_8, %c0_9] : memref<4x128xf32, #tpu.memory_space<vmem>>, vector<4x128xf32>
    %c0_10 = arith.constant 0 : index
    %c0_11 = arith.constant 0 : index
    %8 = vector.load %arg6[%c0_10, %c0_11] : memref<128x256xf32, #tpu.memory_space<vmem>>, vector<128x256xf32>
    %cst_12 = arith.constant dense<0.000000e+00> : vector<4x256xf32>
    %9 = tpu.matmul %7, %8, %cst_12 {dimension_numbers = #tpu.dot_dimension_numbers<[1], [0], [0], [1], [0, 0, 1, 1], [], []>} : vector<4x128xf32>, vector<128x256xf32>, vector<4x256xf32> -> vector<4x256xf32>
    %10 = arith.addf %6, %9 : vector<4x256xf32>
    %c0_13 = arith.constant 0 : index
    %c0_14 = arith.constant 0 : index
    %11 = vector.load %arg7[%c0_13, %c0_14] : memref<1x256xf32, #tpu.memory_space<vmem>>, vector<1x256xf32>
    %12 = vector.broadcast %11 : vector<1x256xf32> to vector<4x256xf32>
    %13 = arith.addf %10, %12 : vector<4x256xf32>
    %14 = math.tanh %13 : vector<4x256xf32>
    %c0_15 = arith.constant 0 : index
    %c0_16 = arith.constant 0 : index
    %15 = vector.load %arg8[%c0_15, %c0_16] : memref<4x256xf32, #tpu.memory_space<vmem>>, vector<4x256xf32>
    tpu.vector_store %arg8[%c0_15, %c0_16], %14 {strides = array<i32>} : memref<4x256xf32, #tpu.memory_space<vmem>>, vector<4x256xf32>,
    return
  }
  func.func @transform_0(%arg0: i32) -> (i32, i32) {
    %c0_i32 = arith.constant 0 : i32
    %c0_i32_0 = arith.constant 0 : i32
    return %arg0, %c0_i32 : i32, i32
  }
  func.func @transform_1(%arg0: i32) -> (i32, i32) {
    %c0_i32 = arith.constant 0 : i32
    %c0_i32_0 = arith.constant 0 : i32
    return %arg0, %c0_i32 : i32, i32
  }
  func.func @transform_2(%arg0: i32) -> (i32, i32) {
    %c0_i32 = arith.constant 0 : i32
    %c0_i32_0 = arith.constant 0 : i32
    return %arg0, %c0_i32 : i32, i32
  }
  func.func @transform_3(%arg0: i32) -> (i32, i32) {
    %c0_i32 = arith.constant 0 : i32
    %c0_i32_0 = arith.constant 0 : i32
    %c0_i32_1 = arith.constant 0 : i32
    return %c0_i32, %c0_i32_0 : i32, i32
  }
  func.func @transform_4(%arg0: i32) -> (i32, i32) {
    %c0_i32 = arith.constant 0 : i32
    %c0_i32_0 = arith.constant 0 : i32
    %c0_i32_1 = arith.constant 0 : i32
    return %c0_i32, %c0_i32_0 : i32, i32
  }
  func.func @transform_5(%arg0: i32) -> (i32, i32) {
    %c0_i32 = arith.constant 0 : i32
    %c0_i32_0 = arith.constant 0 : i32
    %c0_i32_1 = arith.constant 0 : i32
    return %c0_i32, %c0_i32_0 : i32, i32
  }
  func.func @transform_6(%arg0: i32) -> (i32, i32) {
    %c0_i32 = arith.constant 0 : i32
    %c0_i32_0 = arith.constant 0 : i32
    %c0_i32_1 = arith.constant 0 : i32
    return %c0_i32, %c0_i32_0 : i32, i32
  }
  func.func @transform_7(%arg0: i32) -> (i32, i32) {
    %c0_i32 = arith.constant 0 : i32
    %c0_i32_0 = arith.constant 0 : i32
    return %arg0, %c0_i32 : i32, i32
  }
}

</mosaic_0001>

<bundles_post_ra>
// kernel: esage_conv_forward.3
= control target key start
LH: loop header
LB: loop body
LE: loop exit
PB: predicated region body
PF: predicated region fallthrough
CT: control target
= control target key end

     0   :  { %vm179_vm0 = vcmask 1043456   ;;  %s425_s2 = inlined_call_operand.vmem [shape: f32[128,256], index: 2, kind: input, shape index: {}]   ;;  %s426_s3 = inlined_call_operand.vmem [shape: f32[128,256], index: 3, kind: input, shape index: {}]   ;;  %s427_s0 = inlined_call_operand.vmem [shape: f32[4,128], index: 0, kind: input, shape index: {}]   ;;  %s428_s1 = inlined_call_operand.vmem [shape: f32[4,128], index: 1, kind: input, shape index: {}]   ;;  %s429_s4 = inlined_call_operand.vmem [shape: f32[1,256], index: 4, kind: input, shape index: {}]   ;;  %s430_s5 = inlined_call_operand.vmem [shape: f32[4,256], index: 5, kind: output, shape index: {}]  }
   0x1   :  { %v52_v0 = vld [vmem:[%s425_s2 + $0xf8] sm:$0xff]  ;;  %v51_v1 = vld [vmem:[%s425_s2 + $0xf0] sm:$0xff]  ;;  %v50_v2 = vld [vmem:[%s425_s2 + $0xe8] sm:$0xff] }
   0x2   :  { %146 = vmatpush.msra.mxu3 %v52_v0  ;;  %126 = vmatpush.msra.mxu2 %v51_v1  ;;  %v49_v3 = vld [vmem:[%s425_s2 + $0xe0] sm:$0xff]  ;;  %v85_v4 = vld [vmem:[%s426_s3 + $0xf8] sm:$0xff]  ;;  %v47_v6 = vld [vmem:[%s425_s2 + $0xd0] sm:$0xff] }
   0x3   :  { %v48_v5 = vld [vmem:[%s425_s2 + $0xd8] sm:$0xff]  ;;  %106 = vmatpush.msra.mxu1 %v85_v4  ;;  %v84_v7 = vld [vmem:[%s426_s3 + $0xf0] sm:$0xff]  ;;  %v46_v8 = vld [vmem:[%s425_s2 + $0xc8] sm:$0xff] }
   0x4   :  { %147 = vmatpush.msra.mxu3 %v50_v2  ;;  %127 = vmatpush.msra.mxu2 %v49_v3  ;;  %v83_v9 = vld [vmem:[%s426_s3 + $0xe8] sm:$0xff]  ;;  %v45_v10 = vld [vmem:[%s425_s2 + $0xc0] sm:$0xff]  ;;  %v81_v12 = vld [vmem:[%s426_s3 + $0xd8] sm:$0xff] }
   0x5   :  { %86 = vmatpush.msra.mxu0 %v84_v7  ;;  %107 = vmatpush.msra.mxu1 %v83_v9  ;;  %v82_v11 = vld [vmem:[%s426_s3 + $0xe0] sm:$0xff]  ;;  %v80_v13 = vld [vmem:[%s426_s3 + $0xd0] sm:$0xff]  ;;  %v79_v14 = vld [vmem:[%s426_s3 + $0xc8] sm:$0xff] }
   0x6   :  { %148 = vmatpush.msra.mxu3 %v48_v5  ;;  %128 = vmatpush.msra.mxu2 %v47_v6  ;;  %v44_v15 = vld [vmem:[%s425_s2 + $0xb8] sm:$0xff]  ;;  %v43_v16 = vld [vmem:[%s425_s2 + $0xb0] sm:$0xff]  ;;  %v78_v17 = vld [vmem:[%s426_s3 + $0xc0] sm:$0xff] }
   0x7   :  { %87 = vmatpush.msra.mxu0 %v82_v11  ;;  %108 = vmatpush.msra.mxu1 %v81_v12  ;;  %v77_v18 = vld [vmem:[%s426_s3 + $0xb8] sm:$0xff]  ;;  %v42_v19 = vld [vmem:[%s425_s2 + $0xa8] sm:$0xff]  ;;  %v41_v20 = vld [vmem:[%s425_s2 + $0xa0] sm:$0xff] }
   0x8   :  { %149 = vmatpush.msra.mxu3 %v46_v8  ;;  %129 = vmatpush.msra.mxu2 %v45_v10  ;;  %v76_v21 = vld [vmem:[%s426_s3 + $0xb0] sm:$0xff]  ;;  %v75_v22 = vld [vmem:[%s426_s3 + $0xa8] sm:$0xff]  ;;  %v40_v23 = vld [vmem:[%s425_s2 + $0x98] sm:$0xff] }
   0x9   :  { %88 = vmatpush.msra.mxu0 %v80_v13  ;;  %109 = vmatpush.msra.mxu1 %v79_v14  ;;  %v39_v24 = vld [vmem:[%s425_s2 + $0x90] sm:$0xff]  ;;  %v74_v25 = vld [vmem:[%s426_s3 + $0xa0] sm:$0xff]  ;;  %v73_v26 = vld [vmem:[%s426_s3 + $0x98] sm:$0xff] }
   0xa   :  { %150 = vmatpush.msra.mxu3 %v44_v15  ;;  %130 = vmatpush.msra.mxu2 %v43_v16  ;;  %v38_v27 = vld [vmem:[%s425_s2 + $0x88] sm:$0xff]  ;;  %v37_v28 = vld [vmem:[%s425_s2 + $0x80] sm:$0xff]  ;;  %v72_v29 = vld [vmem:[%s426_s3 + $0x90] sm:$0xff] }
   0xb   :  { %89 = vmatpush.msra.mxu0 %v78_v17  ;;  %110 = vmatpush.msra.mxu1 %v77_v18  ;;  %v71_v30 = vld [vmem:[%s426_s3 + $0x88] sm:$0xff]  ;;  %v36_v31 = vld [vmem:[%s425_s2 + $0x78] sm:$0xff]  ;;  %v35_v32 = vld [vmem:[%s425_s2 + $0x70] sm:$0xff] }
   0xc   :  { %151 = vmatpush.msra.mxu3 %v42_v19  ;;  %131 = vmatpush.msra.mxu2 %v41_v20  ;;  %v70_v33 = vld [vmem:[%s426_s3 + $0x80] sm:$0xff]  ;;  %v69_v34 = vld [vmem:[%s426_s3 + $0x78] sm:$0xff]  ;;  %v34_v35 = vld [vmem:[%s425_s2 + $0x68] sm:$0xff] }
   0xd   :  { %90 = vmatpush.msra.mxu0 %v76_v21  ;;  %111 = vmatpush.msra.mxu1 %v75_v22  ;;  %v33_v36 = vld [vmem:[%s425_s2 + $0x60] sm:$0xff]  ;;  %v68_v37 = vld [vmem:[%s426_s3 + $0x70] sm:$0xff]  ;;  %v67_v38 = vld [vmem:[%s426_s3 + $0x68] sm:$0xff] }
   0xe   :  { %152 = vmatpush.msra.mxu3 %v40_v23  ;;  %132 = vmatpush.msra.mxu2 %v39_v24  ;;  %v32_v39 = vld [vmem:[%s425_s2 + $0x58] sm:$0xff]  ;;  %v31_v40 = vld [vmem:[%s425_s2 + $0x50] sm:$0xff]  ;;  %v66_v41 = vld [vmem:[%s426_s3 + $0x60] sm:$0xff] }
   0xf   :  { %91 = vmatpush.msra.mxu0 %v74_v25  ;;  %112 = vmatpush.msra.mxu1 %v73_v26  ;;  %v65_v42 = vld [vmem:[%s426_s3 + $0x58] sm:$0xff]  ;;  %v30_v43 = vld [vmem:[%s425_s2 + $0x48] sm:$0xff]  ;;  %v29_v44 = vld [vmem:[%s425_s2 + $0x40] sm:$0xff] }
  0x10   :  { %153 = vmatpush.msra.mxu3 %v38_v27  ;;  %133 = vmatpush.msra.mxu2 %v37_v28  ;;  %v64_v45 = vld [vmem:[%s426_s3 + $0x50] sm:$0xff]  ;;  %v63_v46 = vld [vmem:[%s426_s3 + $0x48] sm:$0xff]  ;;  %v28_v47 = vld [vmem:[%s425_s2 + $0x38] sm:$0xff] }
  0x11   :  { %92 = vmatpush.msra.mxu0 %v72_v29  ;;  %113 = vmatpush.msra.mxu1 %v71_v30  ;;  %v27_v48 = vld [vmem:[%s425_s2 + $0x30] sm:$0xff]  ;;  %v62_v49 = vld [vmem:[%s426_s3 + $0x40] sm:$0xff]  ;;  %v61_v50 = vld [vmem:[%s426_s3 + $0x38] sm:$0xff] }
  0x12   :  { %154 = vmatpush.msra.mxu3 %v36_v31  ;;  %134 = vmatpush.msra.mxu2 %v35_v32  ;;  %v26_v51 = vld [vmem:[%s425_s2 + $0x28] sm:$0xff]  ;;  %v25_v52 = vld [vmem:[%s425_s2 + $0x20] sm:$0xff]  ;;  %v60_v53 = vld [vmem:[%s426_s3 + $0x30] sm:$0xff] }
  0x13   :  { %93 = vmatpush.msra.mxu0 %v70_v33  ;;  %114 = vmatpush.msra.mxu1 %v69_v34  ;;  %v59_v54 = vld [vmem:[%s426_s3 + $0x28] sm:$0xff]  ;;  %v24_v55 = vld [vmem:[%s425_s2 + $0x18] sm:$0xff]  ;;  %v23_v56 = vld [vmem:[%s425_s2 + $0x10] sm:$0xff] }
  0x14   :  { %155 = vmatpush.msra.mxu3 %v34_v35  ;;  %135 = vmatpush.msra.mxu2 %v33_v36  ;;  %v58_v57 = vld [vmem:[%s426_s3 + $0x20] sm:$0xff]  ;;  %v57_v58 = vld [vmem:[%s426_s3 + $0x18] sm:$0xff]  ;;  %v22_v59 = vld [vmem:[%s425_s2 + $0x8] sm:$0xff] }
  0x15   :  { %94 = vmatpush.msra.mxu0 %v68_v37  ;;  %115 = vmatpush.msra.mxu1 %v67_v38  ;;  %v21_v60 = vld [vmem:[%s425_s2] sm:$0xff]  ;;  %v56_v62 = vld [vmem:[%s426_s3 + $0x10] sm:$0xff]  ;;  %v55_v63 = vld [vmem:[%s426_s3 + $0x8] sm:$0xff] }
  0x16   :  { %156 = vmatpush.msra.mxu3 %v32_v39  ;;  %136 = vmatpush.msra.mxu2 %v31_v40  ;;  %v20_v61 = vld [vmem:[%s427_s0] sm:$0xf] }
  0x17   :  { %95 = vmatpush.msra.mxu0 %v66_v41  ;;  %116 = vmatpush.msra.mxu1 %v65_v42  ;;  %v53_v0 = vld [vmem:[%s428_s1] sm:$0xf] }
  0x18   :  { %157 = vmatpush.msra.mxu3 %v30_v43  ;;  %137 = vmatpush.msra.mxu2 %v29_v44  ;;  %v54_v1 = vld [vmem:[%s426_s3] sm:$0xff] }
  0x19   :  { %96 = vmatpush.msra.mxu0 %v64_v45  ;;  %117 = vmatpush.msra.mxu1 %v63_v46  ;;  %v166_v2 = vld [vmem:[%s429_s4] sm:$0x3] }
  0x1a   :  { %158 = vmatpush.msra.mxu3 %v28_v47  ;;  %138 = vmatpush.msra.mxu2 %v27_v48  ;;  %v169_v5 = vperm.slane %v166_v2, 1  ;;  %v168_v6 = vperm.slane %v166_v2, 0 }
  0x1b   :  { %97 = vmatpush.msra.mxu0 %v62_v49  ;;  %118 = vmatpush.msra.mxu1 %v61_v50 }
  0x1c   :  { %159 = vmatpush.msra.mxu3 %v26_v51  ;;  %139 = vmatpush.msra.mxu2 %v25_v52 }
  0x1d   :  { %98 = vmatpush.msra.mxu0 %v60_v53  ;;  %119 = vmatpush.msra.mxu1 %v59_v54 }
  0x1e   :  { %160 = vmatpush.msra.mxu3 %v24_v55  ;;  %140 = vmatpush.msra.mxu2 %v23_v56 }
  0x1f   :  { %99 = vmatpush.msra.mxu0 %v58_v57  ;;  %120 = vmatpush.msra.mxu1 %v57_v58 }
  0x20   :  { %161 = vmatpush.msra.mxu3 %v22_v59  ;;  %141 = vmatpush.msra.mxu2 %v21_v60 }
  0x21   :  { %162 = vmatmul.f32.vlgmr.msra.gmra.mxu3 %v20_v61  ;;  %142 = vmatmul.f32.vlgmr.msra.gmra.mxu2 %v20_v61 }
  0x22   :  { %100 = vmatpush.msra.mxu0 %v56_v62  ;;  %121 = vmatpush.msra.mxu1 %v55_v63 }
  0x23   :  { %122 = vmatmul.f32.vlgmr.msra.gmra.mxu1 %v53_v0 }
  0x24   :  { %101 = vmatpush.msra.mxu0 %v54_v1 }
  0x25   :  { %102 = vmatmul.f32.vlgmr.msra.gmra.mxu0 %v53_v0 }
  0xa0   :  { %v123_v3 = vpop.f32.mrf.mxu1 }
  0xa2   :  { %v103_v4 = vpop.f32.mrf.mxu0 }
  0xa4   :  { %v163_v7 = vpop.f32.mrf.mxu3  ;;  %v143_v8 = vpop.f32.mrf.mxu2 }
  0xa5   :  { %v164_v9 = vadd.f32 %v163_v7, %v123_v3  ;;  %v144_v10 = vadd.f32 %v143_v8, %v103_v4 }
  0xa7   :  { %v173_v11 = vadd.f32 %v169_v5, %v164_v9  ;;  %v172_v12 = vadd.f32 %v168_v6, %v144_v10 }
  0xa9   :  { %187 = vtanh.f32 %v173_v11 }
  0xaa   :  { %189 = vtanh.f32 %v172_v12 }
  0xaf   :  { %v188_v13 = vpop.eup %187 }
  0xb0   :  { %v190_v14 = vpop.eup %189  ;;  %v178_v15 = vrot.slane %v188_v13, 4 }
  0xb2   :  { %v180_v16 = vsel %vm179_vm0, %v190_v14, %v178_v15 }
  0xb3   :  { %182 = vst [vmem:[%s430_s5] sm:$0xff] %v180_v16 }

// kernel: esage_conv_forward.4
= control target key start
LH: loop header
LB: loop body
LE: loop exit
PB: predicated region body
PF: predicated region fallthrough
CT: control target
= control target key end

     0   :  { %vm257_vm0 = vcmask 1041408   ;;  %s599_s3 = inlined_call_operand.vmem [shape: f32[128,256], index: 3, kind: input, shape index: {}]   ;;  %s600_s2 = inlined_call_operand.vmem [shape: f32[256,256], index: 2, kind: input, shape index: {}]   ;;  %s601_s0 = inlined_call_operand.vmem [shape: f32[2,256], index: 0, kind: input, shape index: {}]   ;;  %s602_s1 = inlined_call_operand.vmem [shape: f32[2,128], index: 1, kind: input, shape index: {}]   ;;  %s603_s4 = inlined_call_operand.vmem [shape: f32[1,256], index: 4, kind: input, shape index: {}]   ;;  %s604_s5 = inlined_call_operand.vmem [shape: f32[2,256], index: 5, kind: output, shape index: {}]  }
   0x1   :  { %v116_v0 = vld [vmem:[%s599_s3 + $0xf0] sm:$0xff]  ;;  %v114_v1 = vld [vmem:[%s599_s3 + $0xe0] sm:$0xff]  ;;  %v117_v2 = vld [vmem:[%s599_s3 + $0xf8] sm:$0xff] }
   0x2   :  { %118 = vmatpush.msra.mxu0 %v116_v0  ;;  %138 = vmatpush.msra.mxu1 %v117_v2  ;;  %v115_v3 = vld [vmem:[%s599_s3 + $0xe8] sm:$0xff]  ;;  %v112_v4 = vld [vmem:[%s599_s3 + $0xd0] sm:$0xff]  ;;  %v113_v5 = vld [vmem:[%s599_s3 + $0xd8] sm:$0xff] }
   0x3   :  { %v110_v6 = vld [vmem:[%s599_s3 + $0xc0] sm:$0xff]  ;;  %v111_v7 = vld [vmem:[%s599_s3 + $0xc8] sm:$0xff]  ;;  %v51_v8 = vld [vmem:[%s600_s2 + $0xf0] sm:$0xff] }
   0x4   :  { %119 = vmatpush.msra.mxu0 %v114_v1  ;;  %139 = vmatpush.msra.mxu1 %v115_v3  ;;  %v108_v9 = vld [vmem:[%s599_s3 + $0xb0] sm:$0xff]  ;;  %v109_v10 = vld [vmem:[%s599_s3 + $0xb8] sm:$0xff]  ;;  %v49_v11 = vld [vmem:[%s600_s2 + $0xe0] sm:$0xff] }
   0x5   :  { %164 = vmatpush.msra.mxu2 %v51_v8  ;;  %v106_v12 = vld [vmem:[%s599_s3 + $0xa0] sm:$0xff]  ;;  %v83_v13 = vld [vmem:[%s600_s2 + $0x1f0] sm:$0xff]  ;;  %v107_v14 = vld [vmem:[%s599_s3 + $0xa8] sm:$0xff] }
   0x6   :  { %120 = vmatpush.msra.mxu0 %v112_v4  ;;  %140 = vmatpush.msra.mxu1 %v113_v5  ;;  %v47_v15 = vld [vmem:[%s600_s2 + $0xd0] sm:$0xff]  ;;  %v81_v16 = vld [vmem:[%s600_s2 + $0x1e0] sm:$0xff]  ;;  %v105_v20 = vld [vmem:[%s599_s3 + $0x98] sm:$0xff] }
   0x7   :  { %165 = vmatpush.msra.mxu2 %v49_v11  ;;  %184 = vmatpush.msra.mxu3 %v83_v13  ;;  %v45_v17 = vld [vmem:[%s600_s2 + $0xc0] sm:$0xff]  ;;  %v79_v18 = vld [vmem:[%s600_s2 + $0x1d0] sm:$0xff]  ;;  %v103_v24 = vld [vmem:[%s599_s3 + $0x88] sm:$0xff] }
   0x8   :  { %121 = vmatpush.msra.mxu0 %v110_v6  ;;  %141 = vmatpush.msra.mxu1 %v111_v7  ;;  %v104_v19 = vld [vmem:[%s599_s3 + $0x90] sm:$0xff]  ;;  %v77_v22 = vld [vmem:[%s600_s2 + $0x1c0] sm:$0xff]  ;;  %v101_v28 = vld [vmem:[%s599_s3 + $0x78] sm:$0xff] }
   0x9   :  { %166 = vmatpush.msra.mxu2 %v47_v15  ;;  %185 = vmatpush.msra.mxu3 %v81_v16  ;;  %v43_v21 = vld [vmem:[%s600_s2 + $0xb0] sm:$0xff]  ;;  %v102_v23 = vld [vmem:[%s599_s3 + $0x80] sm:$0xff]  ;;  %v99_v32 = vld [vmem:[%s599_s3 + $0x68] sm:$0xff] }
   0xa   :  { %122 = vmatpush.msra.mxu0 %v108_v9  ;;  %142 = vmatpush.msra.mxu1 %v109_v10  ;;  %v41_v25 = vld [vmem:[%s600_s2 + $0xa0] sm:$0xff]  ;;  %v75_v26 = vld [vmem:[%s600_s2 + $0x1b0] sm:$0xff]  ;;  %v97_v36 = vld [vmem:[%s599_s3 + $0x58] sm:$0xff] }
   0xb   :  { %167 = vmatpush.msra.mxu2 %v45_v17  ;;  %186 = vmatpush.msra.mxu3 %v79_v18  ;;  %v100_v27 = vld [vmem:[%s599_s3 + $0x70] sm:$0xff]  ;;  %v73_v30 = vld [vmem:[%s600_s2 + $0x1a0] sm:$0xff]  ;;  %v95_v40 = vld [vmem:[%s599_s3 + $0x48] sm:$0xff] }
   0xc   :  { %123 = vmatpush.msra.mxu0 %v106_v12  ;;  %143 = vmatpush.msra.mxu1 %v107_v14  ;;  %v39_v29 = vld [vmem:[%s600_s2 + $0x90] sm:$0xff]  ;;  %v98_v31 = vld [vmem:[%s599_s3 + $0x60] sm:$0xff]  ;;  %v93_v44 = vld [vmem:[%s599_s3 + $0x38] sm:$0xff] }
   0xd   :  { %168 = vmatpush.msra.mxu2 %v43_v21  ;;  %187 = vmatpush.msra.mxu3 %v77_v22  ;;  %v37_v33 = vld [vmem:[%s600_s2 + $0x80] sm:$0xff]  ;;  %v71_v34 = vld [vmem:[%s600_s2 + $0x190] sm:$0xff]  ;;  %v91_v48 = vld [vmem:[%s599_s3 + $0x28] sm:$0xff] }
   0xe   :  { %124 = vmatpush.msra.mxu0 %v104_v19  ;;  %144 = vmatpush.msra.mxu1 %v105_v20  ;;  %v96_v35 = vld [vmem:[%s599_s3 + $0x50] sm:$0xff]  ;;  %v69_v38 = vld [vmem:[%s600_s2 + $0x180] sm:$0xff]  ;;  %v89_v52 = vld [vmem:[%s599_s3 + $0x18] sm:$0xff] }
   0xf   :  { %169 = vmatpush.msra.mxu2 %v41_v25  ;;  %188 = vmatpush.msra.mxu3 %v75_v26  ;;  %v35_v37 = vld [vmem:[%s600_s2 + $0x70] sm:$0xff]  ;;  %v94_v39 = vld [vmem:[%s599_s3 + $0x40] sm:$0xff]  ;;  %v87_v57 = vld [vmem:[%s599_s3 + $0x8] sm:$0xff] }
  0x10   :  { %125 = vmatpush.msra.mxu0 %v102_v23  ;;  %145 = vmatpush.msra.mxu1 %v103_v24  ;;  %v33_v41 = vld [vmem:[%s600_s2 + $0x60] sm:$0xff]  ;;  %v67_v42 = vld [vmem:[%s600_s2 + $0x170] sm:$0xff]  ;;  %v52_v58 = vld [vmem:[%s600_s2 + $0xf8] sm:$0xff] }
  0x11   :  { %170 = vmatpush.msra.mxu2 %v39_v29  ;;  %189 = vmatpush.msra.mxu3 %v73_v30  ;;  %v92_v43 = vld [vmem:[%s599_s3 + $0x30] sm:$0xff]  ;;  %v65_v46 = vld [vmem:[%s600_s2 + $0x160] sm:$0xff]  ;;  %v84_v59 = vld [vmem:[%s600_s2 + $0x1f8] sm:$0xff] }
  0x12   :  { %126 = vmatpush.msra.mxu0 %v100_v27  ;;  %146 = vmatpush.msra.mxu1 %v101_v28  ;;  %v31_v45 = vld [vmem:[%s600_s2 + $0x50] sm:$0xff]  ;;  %v90_v47 = vld [vmem:[%s599_s3 + $0x20] sm:$0xff]  ;;  %v50_v62 = vld [vmem:[%s600_s2 + $0xe8] sm:$0xff] }
  0x13   :  { %171 = vmatpush.msra.mxu2 %v37_v33  ;;  %190 = vmatpush.msra.mxu3 %v71_v34  ;;  %v29_v49 = vld [vmem:[%s600_s2 + $0x40] sm:$0xff]  ;;  %v63_v50 = vld [vmem:[%s600_s2 + $0x150] sm:$0xff]  ;;  %v82_v63 = vld [vmem:[%s600_s2 + $0x1e8] sm:$0xff] }
  0x14   :  { %127 = vmatpush.msra.mxu0 %v98_v31  ;;  %147 = vmatpush.msra.mxu1 %v99_v32  ;;  %v88_v51 = vld [vmem:[%s599_s3 + $0x10] sm:$0xff]  ;;  %v20_v53 = vld [vmem:[%s601_s0] sm:$0xf]  ;;  %v48_v2 = vld [vmem:[%s600_s2 + $0xd8] sm:$0xff] }
  0x15   :  { %172 = vmatpush.msra.mxu2 %v35_v37  ;;  %191 = vmatpush.msra.mxu3 %v69_v38  ;;  %v27_v54 = vld [vmem:[%s600_s2 + $0x30] sm:$0xff]  ;;  %v61_v55 = vld [vmem:[%s600_s2 + $0x140] sm:$0xff]  ;;  %159 = vst [vmem:[#allocation1] ss:$4 sm:$0xff] %v20_v53  ;;  %v80_v3 = vld [vmem:[%s600_s2 + $0x1d8] sm:$0xff] }
  0x16   :  { %128 = vmatpush.msra.mxu0 %v96_v35  ;;  %148 = vmatpush.msra.mxu1 %v97_v36  ;;  %v86_v56 = vld [vmem:[%s599_s3] sm:$0xff]  ;;  %v59_v61 = vld [vmem:[%s600_s2 + $0x130] sm:$0xff]  ;;  %v46_v6 = vld [vmem:[%s600_s2 + $0xc8] sm:$0xff] }
  0x17   :  { %173 = vmatpush.msra.mxu2 %v33_v41  ;;  %192 = vmatpush.msra.mxu3 %v67_v42  ;;  %v25_v60 = vld [vmem:[%s600_s2 + $0x20] sm:$0xff]  ;;  %v23_v0 = vld [vmem:[%s600_s2 + $0x10] sm:$0xff]  ;;  %v78_v7 = vld [vmem:[%s600_s2 + $0x1c8] sm:$0xff] }
  0x18   :  { %129 = vmatpush.msra.mxu0 %v94_v39  ;;  %149 = vmatpush.msra.mxu1 %v95_v40  ;;  %v57_v1 = vld [vmem:[%s600_s2 + $0x120] sm:$0xff]  ;;  %v55_v5 = vld [vmem:[%s600_s2 + $0x110] sm:$0xff]  ;;  %v44_v10 = vld [vmem:[%s600_s2 + $0xb8] sm:$0xff] }
  0x19   :  { %174 = vmatpush.msra.mxu2 %v31_v45  ;;  %193 = vmatpush.msra.mxu3 %v65_v46  ;;  %v21_v4 = vld [vmem:[%s600_s2] sm:$0xff]  ;;  %v76_v11 = vld [vmem:[%s600_s2 + $0x1b8] sm:$0xff]  ;;  %v42_v14 = vld [vmem:[%s600_s2 + $0xa8] sm:$0xff] }
  0x1a   :  { %130 = vmatpush.msra.mxu0 %v92_v43  ;;  %150 = vmatpush.msra.mxu1 %v93_v44  ;;  %v53_v9 = vld [vmem:[%s600_s2 + $0x100] sm:$0xff]  ;;  %v74_v15 = vld [vmem:[%s600_s2 + $0x1a8] sm:$0xff]  ;;  %v40_v16 = vld [vmem:[%s600_s2 + $0x98] sm:$0xff] }
  0x1b   :  { %175 = vmatpush.msra.mxu2 %v29_v49  ;;  %194 = vmatpush.msra.mxu3 %v63_v50  ;;  %v85_v13 = vld [vmem:[%s602_s1] sm:$0x3]  ;;  %v72_v17 = vld [vmem:[%s600_s2 + $0x198] sm:$0xff]  ;;  %v38_v18 = vld [vmem:[%s600_s2 + $0x88] sm:$0xff] }
  0x1c   :  { %131 = vmatpush.msra.mxu0 %v90_v47  ;;  %151 = vmatpush.msra.mxu1 %v91_v48  ;;  %v160_v8 = vld.sshfl [vmem:[#allocation1] sm:$0xff pattern:$0x73625140]  ;;  %v161_v12 = vld.sshfl [vmem:[#allocation1 + $0x8] sm:$0xff pattern:$0x73625140] }
  0x1d   :  { %176 = vmatpush.msra.mxu2 %v27_v54  ;;  %195 = vmatpush.msra.mxu3 %v61_v55  ;;  %v70_v19 = vld [vmem:[%s600_s2 + $0x188] sm:$0xff]  ;;  %v36_v20 = vld [vmem:[%s600_s2 + $0x78] sm:$0xff]  ;;  %v244_v41 = vld [vmem:[%s603_s4] sm:$0x3] }
  0x1e   :  { %132 = vmatpush.msra.mxu0 %v88_v51  ;;  %152 = vmatpush.msra.mxu1 %v89_v52  ;;  %v68_v21 = vld [vmem:[%s600_s2 + $0x178] sm:$0xff]  ;;  %v34_v22 = vld [vmem:[%s600_s2 + $0x68] sm:$0xff]  ;;  %v246_v45 = vperm.slane %v244_v41, 0  ;;  %v247_v47 = vperm.slane %v244_v41, 1 }
  0x1f   :  { %177 = vmatpush.msra.mxu2 %v25_v60  ;;  %196 = vmatpush.msra.mxu3 %v59_v61  ;;  %v66_v23 = vld [vmem:[%s600_s2 + $0x168] sm:$0xff]  ;;  %v32_v24 = vld [vmem:[%s600_s2 + $0x58] sm:$0xff] }
  0x20   :  { %133 = vmatpush.msra.mxu0 %v86_v56  ;;  %153 = vmatpush.msra.mxu1 %v87_v57  ;;  %v64_v25 = vld [vmem:[%s600_s2 + $0x158] sm:$0xff]  ;;  %v30_v26 = vld [vmem:[%s600_s2 + $0x48] sm:$0xff] }
  0x21   :  { %178 = vmatpush.msra.mxu2 %v23_v0  ;;  %197 = vmatpush.msra.mxu3 %v57_v1  ;;  %v62_v27 = vld [vmem:[%s600_s2 + $0x148] sm:$0xff]  ;;  %v28_v28 = vld [vmem:[%s600_s2 + $0x38] sm:$0xff] }
  0x22   :  { %204 = vmatpush.msrb.mxu0 %v52_v58  ;;  %224 = vmatpush.msrb.mxu1 %v84_v59  ;;  %v60_v29 = vld [vmem:[%s600_s2 + $0x138] sm:$0xff]  ;;  %v26_v30 = vld [vmem:[%s600_s2 + $0x28] sm:$0xff] }
  0x23   :  { %179 = vmatpush.msra.mxu2 %v21_v4  ;;  %198 = vmatpush.msra.mxu3 %v55_v5  ;;  %v58_v31 = vld [vmem:[%s600_s2 + $0x128] sm:$0xff]  ;;  %v24_v32 = vld [vmem:[%s600_s2 + $0x18] sm:$0xff] }
  0x24   :  { %205 = vmatpush.msrb.mxu0 %v50_v62  ;;  %225 = vmatpush.msrb.mxu1 %v82_v63  ;;  %v56_v33 = vld [vmem:[%s600_s2 + $0x118] sm:$0xff]  ;;  %v22_v34 = vld [vmem:[%s600_s2 + $0x8] sm:$0xff] }
  0x25   :  { %180 = vmatmul.f32.vlgmr.msra.gmra.mxu2 %v160_v8  ;;  %199 = vmatpush.msra.mxu3 %v53_v9  ;;  %v54_v35 = vld [vmem:[%s600_s2 + $0x108] sm:$0xff] }
  0x26   :  { %206 = vmatpush.msrb.mxu0 %v48_v2  ;;  %226 = vmatpush.msrb.mxu1 %v80_v3 }
  0x27   :  { %200 = vmatmul.f32.vlgmr.msra.gmra.mxu3 %v161_v12  ;;  %134 = vmatmul.f32.vlgmr.msra.gmra.mxu0 %v85_v13 }
  0x28   :  { %207 = vmatpush.msrb.mxu0 %v46_v6  ;;  %227 = vmatpush.msrb.mxu1 %v78_v7 }
  0x29   :  { %154 = vmatmul.f32.vlgmr.msra.gmra.mxu1 %v85_v13 }
  0x2a   :  { %208 = vmatpush.msrb.mxu0 %v44_v10  ;;  %228 = vmatpush.msrb.mxu1 %v76_v11 }
  0x2c   :  { %209 = vmatpush.msrb.mxu0 %v42_v14  ;;  %229 = vmatpush.msrb.mxu1 %v74_v15 }
  0x2e   :  { %210 = vmatpush.msrb.mxu0 %v40_v16  ;;  %230 = vmatpush.msrb.mxu1 %v72_v17 }
  0x30   :  { %211 = vmatpush.msrb.mxu0 %v38_v18  ;;  %231 = vmatpush.msrb.mxu1 %v70_v19 }
  0x32   :  { %212 = vmatpush.msrb.mxu0 %v36_v20  ;;  %232 = vmatpush.msrb.mxu1 %v68_v21 }
  0x34   :  { %213 = vmatpush.msrb.mxu0 %v34_v22  ;;  %233 = vmatpush.msrb.mxu1 %v66_v23 }
  0x36   :  { %214 = vmatpush.msrb.mxu0 %v32_v24  ;;  %234 = vmatpush.msrb.mxu1 %v64_v25 }
  0x38   :  { %215 = vmatpush.msrb.mxu0 %v30_v26  ;;  %235 = vmatpush.msrb.mxu1 %v62_v27 }
  0x3a   :  { %216 = vmatpush.msrb.mxu0 %v28_v28  ;;  %236 = vmatpush.msrb.mxu1 %v60_v29 }
  0x3c   :  { %217 = vmatpush.msrb.mxu0 %v26_v30  ;;  %237 = vmatpush.msrb.mxu1 %v58_v31 }
  0x3e   :  { %218 = vmatpush.msrb.mxu0 %v24_v32  ;;  %238 = vmatpush.msrb.mxu1 %v56_v33 }
  0x40   :  { %219 = vmatpush.msrb.mxu0 %v22_v34  ;;  %239 = vmatpush.msrb.mxu1 %v54_v35 }
  0x41   :  { %220 = vmatmul.f32.vlgmr.msrb.gmra.mxu0 %v160_v8  ;;  %240 = vmatmul.f32.vlgmr.msrb.gmra.mxu1 %v161_v12 }
  0xa4   :  { %v135_v36 = vpop.f32.mrf.mxu0 }
  0xa6   :  { %v155_v37 = vpop.f32.mrf.mxu1 }
  0xa8   :  { %v181_v38 = vpop.f32.mrf.mxu2 }
  0xa9   :  { %v182_v39 = vadd.f32 %v181_v38, %v135_v36 }
  0xaa   :  { %v201_v40 = vpop.f32.mrf.mxu3 }
  0xab   :  { %v202_v44 = vadd.f32 %v201_v40, %v182_v39 }
  0xad   :  { %v250_v49 = vadd.f32 %v246_v45, %v202_v44 }
  0xbe   :  { %v221_v42 = vpop.f32.mrf.mxu0  ;;  %v241_v43 = vpop.f32.mrf.mxu1 }
  0xbf   :  { %v222_v46 = vadd.f32 %v221_v42, %v155_v37 }
  0xc1   :  { %v242_v48 = vadd.f32 %v241_v43, %v222_v46 }
  0xc3   :  { %v251_v50 = vadd.f32 %v247_v47, %v242_v48 }
  0xc5   :  { %265 = vtanh.f32 %v251_v50 }
  0xc6   :  { %267 = vtanh.f32 %v250_v49 }
  0xcb   :  { %v266_v51 = vpop.eup %265 }
  0xcc   :  { %v256_v52 = vrot.slane %v266_v51, 6  ;;  %v268_v53 = vpop.eup %267 }
  0xce   :  { %v258_v54 = vsel %vm257_vm0, %v268_v53, %v256_v52 }
  0xcf   :  { %260 = vst [vmem:[%s604_s5] sm:$0xf] %v258_v54 }

// kernel: esage_conv_forward.5
= control target key start
LH: loop header
LB: loop body
LE: loop exit
PB: predicated region body
PF: predicated region fallthrough
CT: control target
= control target key end

     0   :  { %vm338_vm0 = vcmask 1043456   ;;  %s789_s4 = inlined_call_operand.vmem [shape: f32[256,256], index: 4, kind: input, shape index: {}]   ;;  %s790_s3 = inlined_call_operand.vmem [shape: f32[128,256], index: 3, kind: input, shape index: {}]   ;;  %s791_s5 = inlined_call_operand.vmem [shape: f32[128,256], index: 5, kind: input, shape index: {}]   ;;  %s792_s1 = inlined_call_operand.vmem [shape: f32[4,256], index: 1, kind: input, shape index: {}]   ;;  %s793_s0 = inlined_call_operand.vmem [shape: f32[4,128], index: 0, kind: input, shape index: {}]   ;;  %s794_s2 = inlined_call_operand.vmem [shape: f32[4,128], index: 2, kind: input, shape index: {}]   ;;  %s795_s6 = inlined_call_operand.vmem [shape: f32[1,256], index: 6, kind: input, shape index: {}]   ;;  %s796_s7 = inlined_call_operand.vmem [shape: f32[4,256], index: 7, kind: output, shape index: {}]  }
   0x1   :  { %v90_v0 = vld [vmem:[%s789_s4 + $0xf0] sm:$0xff]  ;;  %v91_v2 = vld [vmem:[%s789_s4 + $0xf8] sm:$0xff]  ;;  %v88_v4 = vld [vmem:[%s789_s4 + $0xe0] sm:$0xff] }
   0x2   :  { %v122_v1 = vld [vmem:[%s789_s4 + $0x1f0] sm:$0xff]  ;;  %130 = vmatpush.msra.mxu0 %v90_v0  ;;  %v123_v3 = vld [vmem:[%s789_s4 + $0x1f8] sm:$0xff]  ;;  %v120_v5 = vld [vmem:[%s789_s4 + $0x1e0] sm:$0xff]  ;;  %170 = vmatpush.msra.mxu2 %v91_v2 }
   0x3   :  { %150 = vmatpush.msra.mxu1 %v122_v1  ;;  %190 = vmatpush.msra.mxu3 %v123_v3  ;;  %v89_v6 = vld [vmem:[%s789_s4 + $0xe8] sm:$0xff]  ;;  %v86_v8 = vld [vmem:[%s789_s4 + $0xd0] sm:$0xff]  ;;  %v87_v10 = vld [vmem:[%s789_s4 + $0xd8] sm:$0xff] }
   0x4   :  { %v121_v7 = vld [vmem:[%s789_s4 + $0x1e8] sm:$0xff]  ;;  %131 = vmatpush.msra.mxu0 %v88_v4  ;;  %v118_v9 = vld [vmem:[%s789_s4 + $0x1d0] sm:$0xff]  ;;  %v119_v11 = vld [vmem:[%s789_s4 + $0x1d8] sm:$0xff]  ;;  %171 = vmatpush.msra.mxu2 %v89_v6 }
   0x5   :  { %151 = vmatpush.msra.mxu1 %v120_v5  ;;  %191 = vmatpush.msra.mxu3 %v121_v7  ;;  %v84_v12 = vld [vmem:[%s789_s4 + $0xc0] sm:$0xff]  ;;  %v85_v14 = vld [vmem:[%s789_s4 + $0xc8] sm:$0xff]  ;;  %v82_v16 = vld [vmem:[%s789_s4 + $0xb0] sm:$0xff] }
   0x6   :  { %v116_v13 = vld [vmem:[%s789_s4 + $0x1c0] sm:$0xff]  ;;  %132 = vmatpush.msra.mxu0 %v86_v8  ;;  %v117_v15 = vld [vmem:[%s789_s4 + $0x1c8] sm:$0xff]  ;;  %172 = vmatpush.msra.mxu2 %v87_v10  ;;  %v114_v17 = vld [vmem:[%s789_s4 + $0x1b0] sm:$0xff] }
   0x7   :  { %152 = vmatpush.msra.mxu1 %v118_v9  ;;  %192 = vmatpush.msra.mxu3 %v119_v11  ;;  %v83_v18 = vld [vmem:[%s789_s4 + $0xb8] sm:$0xff]  ;;  %v80_v20 = vld [vmem:[%s789_s4 + $0xa0] sm:$0xff]  ;;  %v81_v22 = vld [vmem:[%s789_s4 + $0xa8] sm:$0xff] }
   0x8   :  { %133 = vmatpush.msra.mxu0 %v84_v12  ;;  %v115_v19 = vld [vmem:[%s789_s4 + $0x1b8] sm:$0xff]  ;;  %173 = vmatpush.msra.mxu2 %v85_v14  ;;  %v112_v21 = vld [vmem:[%s789_s4 + $0x1a0] sm:$0xff]  ;;  %v113_v23 = vld [vmem:[%s789_s4 + $0x1a8] sm:$0xff] }
   0x9   :  { %153 = vmatpush.msra.mxu1 %v116_v13  ;;  %193 = vmatpush.msra.mxu3 %v117_v15  ;;  %v78_v24 = vld [vmem:[%s789_s4 + $0x90] sm:$0xff]  ;;  %v79_v26 = vld [vmem:[%s789_s4 + $0x98] sm:$0xff]  ;;  %v76_v28 = vld [vmem:[%s789_s4 + $0x80] sm:$0xff] }
   0xa   :  { %134 = vmatpush.msra.mxu0 %v82_v16  ;;  %174 = vmatpush.msra.mxu2 %v83_v18  ;;  %v110_v25 = vld [vmem:[%s789_s4 + $0x190] sm:$0xff]  ;;  %v111_v27 = vld [vmem:[%s789_s4 + $0x198] sm:$0xff]  ;;  %v108_v29 = vld [vmem:[%s789_s4 + $0x180] sm:$0xff] }
   0xb   :  { %154 = vmatpush.msra.mxu1 %v114_v17  ;;  %194 = vmatpush.msra.mxu3 %v115_v19  ;;  %v77_v30 = vld [vmem:[%s789_s4 + $0x88] sm:$0xff]  ;;  %v74_v32 = vld [vmem:[%s789_s4 + $0x70] sm:$0xff]  ;;  %v75_v34 = vld [vmem:[%s789_s4 + $0x78] sm:$0xff] }
   0xc   :  { %135 = vmatpush.msra.mxu0 %v80_v20  ;;  %175 = vmatpush.msra.mxu2 %v81_v22  ;;  %v109_v31 = vld [vmem:[%s789_s4 + $0x188] sm:$0xff]  ;;  %v106_v33 = vld [vmem:[%s789_s4 + $0x170] sm:$0xff]  ;;  %v107_v35 = vld [vmem:[%s789_s4 + $0x178] sm:$0xff] }
   0xd   :  { %155 = vmatpush.msra.mxu1 %v112_v21  ;;  %195 = vmatpush.msra.mxu3 %v113_v23  ;;  %v72_v36 = vld [vmem:[%s789_s4 + $0x60] sm:$0xff]  ;;  %v73_v38 = vld [vmem:[%s789_s4 + $0x68] sm:$0xff]  ;;  %v70_v40 = vld [vmem:[%s789_s4 + $0x50] sm:$0xff] }
   0xe   :  { %136 = vmatpush.msra.mxu0 %v78_v24  ;;  %176 = vmatpush.msra.mxu2 %v79_v26  ;;  %v104_v37 = vld [vmem:[%s789_s4 + $0x160] sm:$0xff]  ;;  %v105_v39 = vld [vmem:[%s789_s4 + $0x168] sm:$0xff]  ;;  %v102_v41 = vld [vmem:[%s789_s4 + $0x150] sm:$0xff] }
   0xf   :  { %156 = vmatpush.msra.mxu1 %v110_v25  ;;  %196 = vmatpush.msra.mxu3 %v111_v27  ;;  %v71_v42 = vld [vmem:[%s789_s4 + $0x58] sm:$0xff]  ;;  %v68_v44 = vld [vmem:[%s789_s4 + $0x40] sm:$0xff]  ;;  %v69_v46 = vld [vmem:[%s789_s4 + $0x48] sm:$0xff] }
  0x10   :  { %137 = vmatpush.msra.mxu0 %v76_v28  ;;  %177 = vmatpush.msra.mxu2 %v77_v30  ;;  %v103_v43 = vld [vmem:[%s789_s4 + $0x158] sm:$0xff]  ;;  %v100_v45 = vld [vmem:[%s789_s4 + $0x140] sm:$0xff]  ;;  %v101_v47 = vld [vmem:[%s789_s4 + $0x148] sm:$0xff] }
  0x11   :  { %157 = vmatpush.msra.mxu1 %v108_v29  ;;  %197 = vmatpush.msra.mxu3 %v109_v31  ;;  %v66_v48 = vld [vmem:[%s789_s4 + $0x30] sm:$0xff]  ;;  %v67_v50 = vld [vmem:[%s789_s4 + $0x38] sm:$0xff]  ;;  %v64_v52 = vld [vmem:[%s789_s4 + $0x20] sm:$0xff] }
  0x12   :  { %138 = vmatpush.msra.mxu0 %v74_v32  ;;  %178 = vmatpush.msra.mxu2 %v75_v34  ;;  %v98_v49 = vld [vmem:[%s789_s4 + $0x130] sm:$0xff]  ;;  %v99_v51 = vld [vmem:[%s789_s4 + $0x138] sm:$0xff]  ;;  %v96_v53 = vld [vmem:[%s789_s4 + $0x120] sm:$0xff] }
  0x13   :  { %158 = vmatpush.msra.mxu1 %v106_v33  ;;  %198 = vmatpush.msra.mxu3 %v107_v35  ;;  %v65_v54 = vld [vmem:[%s789_s4 + $0x28] sm:$0xff]  ;;  %v62_v56 = vld [vmem:[%s789_s4 + $0x10] sm:$0xff]  ;;  %v63_v58 = vld [vmem:[%s789_s4 + $0x18] sm:$0xff] }
  0x14   :  { %139 = vmatpush.msra.mxu0 %v72_v36  ;;  %179 = vmatpush.msra.mxu2 %v73_v38  ;;  %v97_v55 = vld [vmem:[%s789_s4 + $0x128] sm:$0xff]  ;;  %v94_v57 = vld [vmem:[%s789_s4 + $0x110] sm:$0xff]  ;;  %v95_v59 = vld [vmem:[%s789_s4 + $0x118] sm:$0xff] }
  0x15   :  { %159 = vmatpush.msra.mxu1 %v104_v37  ;;  %199 = vmatpush.msra.mxu3 %v105_v39  ;;  %v60_v60 = vld [vmem:[%s789_s4] sm:$0xff]  ;;  %v61_v62 = vld [vmem:[%s789_s4 + $0x8] sm:$0xff]  ;;  %v57_v0 = vld [vmem:[%s790_s3 + $0xf0] sm:$0xff] }
  0x16   :  { %140 = vmatpush.msra.mxu0 %v70_v40  ;;  %180 = vmatpush.msra.mxu2 %v71_v42  ;;  %v92_v61 = vld [vmem:[%s789_s4 + $0x100] sm:$0xff]  ;;  %v93_v63 = vld [vmem:[%s789_s4 + $0x108] sm:$0xff]  ;;  %v58_v1 = vld [vmem:[%s790_s3 + $0xf8] sm:$0xff] }
  0x17   :  { %160 = vmatpush.msra.mxu1 %v102_v41  ;;  %200 = vmatpush.msra.mxu3 %v103_v43  ;;  %v281_v2 = vld [vmem:[%s791_s5 + $0xf0] sm:$0xff]  ;;  %v282_v3 = vld [vmem:[%s791_s5 + $0xf8] sm:$0xff]  ;;  %v55_v4 = vld [vmem:[%s790_s3 + $0xe0] sm:$0xff] }
  0x18   :  { %141 = vmatpush.msra.mxu0 %v68_v44  ;;  %181 = vmatpush.msra.mxu2 %v69_v46  ;;  %v56_v5 = vld [vmem:[%s790_s3 + $0xe8] sm:$0xff]  ;;  %v279_v6 = vld [vmem:[%s791_s5 + $0xe0] sm:$0xff]  ;;  %v53_v8 = vld [vmem:[%s790_s3 + $0xd0] sm:$0xff] }
  0x19   :  { %161 = vmatpush.msra.mxu1 %v100_v45  ;;  %201 = vmatpush.msra.mxu3 %v101_v47  ;;  %v280_v7 = vld [vmem:[%s791_s5 + $0xe8] sm:$0xff]  ;;  %v54_v9 = vld [vmem:[%s790_s3 + $0xd8] sm:$0xff]  ;;  %v277_v10 = vld [vmem:[%s791_s5 + $0xd0] sm:$0xff] }
  0x1a   :  { %142 = vmatpush.msra.mxu0 %v66_v48  ;;  %182 = vmatpush.msra.mxu2 %v67_v50  ;;  %v278_v11 = vld [vmem:[%s791_s5 + $0xd8] sm:$0xff]  ;;  %v51_v12 = vld [vmem:[%s790_s3 + $0xc0] sm:$0xff]  ;;  %v52_v13 = vld [vmem:[%s790_s3 + $0xc8] sm:$0xff] }
  0x1b   :  { %162 = vmatpush.msra.mxu1 %v98_v49  ;;  %202 = vmatpush.msra.mxu3 %v99_v51  ;;  %v275_v14 = vld [vmem:[%s791_s5 + $0xc0] sm:$0xff]  ;;  %v276_v15 = vld [vmem:[%s791_s5 + $0xc8] sm:$0xff]  ;;  %v49_v17 = vld [vmem:[%s790_s3 + $0xb0] sm:$0xff] }
  0x1c   :  { %143 = vmatpush.msra.mxu0 %v64_v52  ;;  %183 = vmatpush.msra.mxu2 %v65_v54  ;;  %v59_v16 = vld [vmem:[%s792_s1] sm:$0xff]  ;;  %v50_v18 = vld [vmem:[%s790_s3 + $0xb8] sm:$0xff]  ;;  %v273_v19 = vld [vmem:[%s791_s5 + $0xb0] sm:$0xff] }
  0x1d   :  { %163 = vmatpush.msra.mxu1 %v96_v53  ;;  %203 = vmatpush.msra.mxu3 %v97_v55  ;;  %125 = vst [vmem:[#allocation1] ss:$2 sm:$0xff] %v59_v16  ;;  %v274_v20 = vld [vmem:[%s791_s5 + $0xb8] sm:$0xff]  ;;  %v47_v21 = vld [vmem:[%s790_s3 + $0xa0] sm:$0xff]  ;;  %v48_v22 = vld [vmem:[%s790_s3 + $0xa8] sm:$0xff] }
  0x1e   :  { %144 = vmatpush.msra.mxu0 %v62_v56  ;;  %184 = vmatpush.msra.mxu2 %v63_v58  ;;  %v271_v23 = vld [vmem:[%s791_s5 + $0xa0] sm:$0xff]  ;;  %v272_v24 = vld [vmem:[%s791_s5 + $0xa8] sm:$0xff]  ;;  %v45_v25 = vld [vmem:[%s790_s3 + $0x90] sm:$0xff] }
  0x1f   :  { %164 = vmatpush.msra.mxu1 %v94_v57  ;;  %204 = vmatpush.msra.mxu3 %v95_v59  ;;  %v46_v26 = vld [vmem:[%s790_s3 + $0x98] sm:$0xff]  ;;  %v269_v27 = vld [vmem:[%s791_s5 + $0x90] sm:$0xff]  ;;  %v43_v29 = vld [vmem:[%s790_s3 + $0x80] sm:$0xff] }
  0x20   :  { %145 = vmatpush.msra.mxu0 %v60_v60  ;;  %185 = vmatpush.msra.mxu2 %v61_v62  ;;  %v270_v28 = vld [vmem:[%s791_s5 + $0x98] sm:$0xff]  ;;  %v44_v30 = vld [vmem:[%s790_s3 + $0x88] sm:$0xff]  ;;  %v267_v31 = vld [vmem:[%s791_s5 + $0x80] sm:$0xff] }
  0x21   :  { %165 = vmatpush.msra.mxu1 %v92_v61  ;;  %205 = vmatpush.msra.mxu3 %v93_v63  ;;  %v268_v32 = vld [vmem:[%s791_s5 + $0x88] sm:$0xff]  ;;  %v41_v33 = vld [vmem:[%s790_s3 + $0x70] sm:$0xff]  ;;  %v42_v34 = vld [vmem:[%s790_s3 + $0x78] sm:$0xff] }
  0x22   :  { %210 = vmatpush.msrb.mxu0 %v57_v0  ;;  %283 = vmatpush.msrb.mxu2 %v281_v2  ;;  %v265_v35 = vld [vmem:[%s791_s5 + $0x70] sm:$0xff]  ;;  %v266_v36 = vld [vmem:[%s791_s5 + $0x78] sm:$0xff]  ;;  %v39_v37 = vld [vmem:[%s790_s3 + $0x60] sm:$0xff] }
  0x23   :  { %230 = vmatpush.msrb.mxu1 %v58_v1  ;;  %303 = vmatpush.msrb.mxu3 %v282_v3  ;;  %v40_v38 = vld [vmem:[%s790_s3 + $0x68] sm:$0xff]  ;;  %v263_v39 = vld [vmem:[%s791_s5 + $0x60] sm:$0xff]  ;;  %v37_v41 = vld [vmem:[%s790_s3 + $0x50] sm:$0xff] }
  0x24   :  { %211 = vmatpush.msrb.mxu0 %v55_v4  ;;  %284 = vmatpush.msrb.mxu2 %v279_v6  ;;  %v264_v40 = vld [vmem:[%s791_s5 + $0x68] sm:$0xff]  ;;  %v38_v42 = vld [vmem:[%s790_s3 + $0x58] sm:$0xff]  ;;  %v261_v43 = vld [vmem:[%s791_s5 + $0x50] sm:$0xff] }
  0x25   :  { %231 = vmatpush.msrb.mxu1 %v56_v5  ;;  %304 = vmatpush.msrb.mxu3 %v280_v7  ;;  %v262_v44 = vld [vmem:[%s791_s5 + $0x58] sm:$0xff]  ;;  %v35_v45 = vld [vmem:[%s790_s3 + $0x40] sm:$0xff]  ;;  %v36_v46 = vld [vmem:[%s790_s3 + $0x48] sm:$0xff] }
  0x26   :  { %212 = vmatpush.msrb.mxu0 %v53_v8  ;;  %285 = vmatpush.msrb.mxu2 %v277_v10  ;;  %v259_v47 = vld [vmem:[%s791_s5 + $0x40] sm:$0xff]  ;;  %v260_v48 = vld [vmem:[%s791_s5 + $0x48] sm:$0xff]  ;;  %v33_v51 = vld [vmem:[%s790_s3 + $0x30] sm:$0xff] }
  0x27   :  { %232 = vmatpush.msrb.mxu1 %v54_v9  ;;  %305 = vmatpush.msrb.mxu3 %v278_v11  ;;  %v126_v49 = vld.sshfl [vmem:[#allocation1] sm:$0xff pattern:$0x75316420]  ;;  %v127_v50 = vld.sshfl [vmem:[#allocation1 + $0x8] sm:$0xff pattern:$0x75316420] }
  0x28   :  { %213 = vmatpush.msrb.mxu0 %v51_v12  ;;  %286 = vmatpush.msrb.mxu2 %v275_v14  ;;  %v34_v52 = vld [vmem:[%s790_s3 + $0x38] sm:$0xff]  ;;  %v257_v53 = vld [vmem:[%s791_s5 + $0x30] sm:$0xff]  ;;  %v31_v55 = vld [vmem:[%s790_s3 + $0x20] sm:$0xff] }
  0x29   :  { %233 = vmatpush.msrb.mxu1 %v52_v13  ;;  %306 = vmatpush.msrb.mxu3 %v276_v15  ;;  %v258_v54 = vld [vmem:[%s791_s5 + $0x38] sm:$0xff]  ;;  %v32_v56 = vld [vmem:[%s790_s3 + $0x28] sm:$0xff]  ;;  %v255_v57 = vld [vmem:[%s791_s5 + $0x20] sm:$0xff] }
  0x2a   :  { %214 = vmatpush.msrb.mxu0 %v49_v17  ;;  %287 = vmatpush.msrb.mxu2 %v273_v19  ;;  %v256_v58 = vld [vmem:[%s791_s5 + $0x28] sm:$0xff]  ;;  %v29_v59 = vld [vmem:[%s790_s3 + $0x10] sm:$0xff]  ;;  %v30_v60 = vld [vmem:[%s790_s3 + $0x18] sm:$0xff] }
  0x2b   :  { %234 = vmatpush.msrb.mxu1 %v50_v18  ;;  %307 = vmatpush.msrb.mxu3 %v274_v20  ;;  %v253_v61 = vld [vmem:[%s791_s5 + $0x10] sm:$0xff]  ;;  %v254_v62 = vld [vmem:[%s791_s5 + $0x18] sm:$0xff]  ;;  %v27_v63 = vld [vmem:[%s790_s3] sm:$0xff] }
  0x2c   :  { %215 = vmatpush.msrb.mxu0 %v47_v21  ;;  %288 = vmatpush.msrb.mxu2 %v271_v23  ;;  %v28_v0 = vld [vmem:[%s790_s3 + $0x8] sm:$0xff]  ;;  %v251_v1 = vld [vmem:[%s791_s5] sm:$0xff] }
  0x2d   :  { %235 = vmatpush.msrb.mxu1 %v48_v22  ;;  %308 = vmatpush.msrb.mxu3 %v272_v24  ;;  %v252_v2 = vld [vmem:[%s791_s5 + $0x8] sm:$0xff]  ;;  %v26_v3 = vld [vmem:[%s793_s0] sm:$0xf] }
  0x2e   :  { %216 = vmatpush.msrb.mxu0 %v45_v25  ;;  %289 = vmatpush.msrb.mxu2 %v269_v27  ;;  %v250_v4 = vld [vmem:[%s794_s2] sm:$0xf] }
  0x2f   :  { %236 = vmatpush.msrb.mxu1 %v46_v26  ;;  %309 = vmatpush.msrb.mxu3 %v270_v28  ;;  %v325_v12 = vld [vmem:[%s795_s6] sm:$0x3] }
  0x30   :  { %217 = vmatpush.msrb.mxu0 %v43_v29  ;;  %290 = vmatpush.msrb.mxu2 %v267_v31  ;;  %v328_v16 = vperm.slane %v325_v12, 1  ;;  %v327_v18 = vperm.slane %v325_v12, 0 }
  0x31   :  { %237 = vmatpush.msrb.mxu1 %v44_v30  ;;  %310 = vmatpush.msrb.mxu3 %v268_v32 }
  0x32   :  { %218 = vmatpush.msrb.mxu0 %v41_v33  ;;  %291 = vmatpush.msrb.mxu2 %v265_v35 }
  0x33   :  { %238 = vmatpush.msrb.mxu1 %v42_v34  ;;  %311 = vmatpush.msrb.mxu3 %v266_v36 }
  0x34   :  { %219 = vmatpush.msrb.mxu0 %v39_v37  ;;  %292 = vmatpush.msrb.mxu2 %v263_v39 }
  0x35   :  { %239 = vmatpush.msrb.mxu1 %v40_v38  ;;  %312 = vmatpush.msrb.mxu3 %v264_v40 }
  0x36   :  { %220 = vmatpush.msrb.mxu0 %v37_v41  ;;  %293 = vmatpush.msrb.mxu2 %v261_v43 }
  0x37   :  { %240 = vmatpush.msrb.mxu1 %v38_v42  ;;  %313 = vmatpush.msrb.mxu3 %v262_v44 }
  0x38   :  { %221 = vmatpush.msrb.mxu0 %v35_v45  ;;  %294 = vmatpush.msrb.mxu2 %v259_v47 }
  0x39   :  { %241 = vmatpush.msrb.mxu1 %v36_v46  ;;  %314 = vmatpush.msrb.mxu3 %v260_v48 }
  0x3a   :  { %146 = vmatmul.f32.vlgmr.msra.gmra.mxu0 %v126_v49  ;;  %166 = vmatmul.f32.vlgmr.msra.gmra.mxu1 %v127_v50 }
  0x3b   :  { %186 = vmatmul.f32.vlgmr.msra.gmra.mxu2 %v126_v49  ;;  %206 = vmatmul.f32.vlgmr.msra.gmra.mxu3 %v127_v50 }
  0x3c   :  { %222 = vmatpush.msrb.mxu0 %v33_v51  ;;  %242 = vmatpush.msrb.mxu1 %v34_v52 }
  0x3d   :  { %295 = vmatpush.msrb.mxu2 %v257_v53  ;;  %315 = vmatpush.msrb.mxu3 %v258_v54 }
  0x3e   :  { %223 = vmatpush.msrb.mxu0 %v31_v55  ;;  %243 = vmatpush.msrb.mxu1 %v32_v56 }
  0x3f   :  { %296 = vmatpush.msrb.mxu2 %v255_v57  ;;  %316 = vmatpush.msrb.mxu3 %v256_v58 }
  0x40   :  { %224 = vmatpush.msrb.mxu0 %v29_v59  ;;  %244 = vmatpush.msrb.mxu1 %v30_v60 }
  0x41   :  { %297 = vmatpush.msrb.mxu2 %v253_v61  ;;  %317 = vmatpush.msrb.mxu3 %v254_v62 }
  0x42   :  { %225 = vmatpush.msrb.mxu0 %v27_v63  ;;  %245 = vmatpush.msrb.mxu1 %v28_v0 }
  0x43   :  { %298 = vmatpush.msrb.mxu2 %v251_v1  ;;  %318 = vmatpush.msrb.mxu3 %v252_v2 }
  0x44   :  { %226 = vmatmul.f32.vlgmr.msrb.gmra.mxu0 %v26_v3  ;;  %246 = vmatmul.f32.vlgmr.msrb.gmra.mxu1 %v26_v3 }
  0x45   :  { %299 = vmatmul.f32.vlgmr.msrb.gmra.mxu2 %v250_v4  ;;  %319 = vmatmul.f32.vlgmr.msrb.gmra.mxu3 %v250_v4 }
  0xb7   :  { %v147_v5 = vpop.f32.mrf.mxu0  ;;  %v167_v6 = vpop.f32.mrf.mxu1 }
  0xb8   :  { %v168_v13 = vadd.f32 %v167_v6, %v147_v5 }
  0xbe   :  { %v187_v7 = vpop.f32.mrf.mxu2  ;;  %v207_v8 = vpop.f32.mrf.mxu3 }
  0xbf   :  { %v208_v9 = vadd.f32 %v207_v8, %v187_v7 }
  0xc1   :  { %v227_v10 = vpop.f32.mrf.mxu0  ;;  %v247_v11 = vpop.f32.mrf.mxu1 }
  0xc2   :  { %v228_v14 = vadd.f32 %v227_v10, %v168_v13  ;;  %v248_v15 = vadd.f32 %v247_v11, %v208_v9 }
  0xc8   :  { %v300_v17 = vpop.f32.mrf.mxu2  ;;  %v320_v19 = vpop.f32.mrf.mxu3 }
  0xc9   :  { %v323_v20 = vadd.f32 %v300_v17, %v228_v14  ;;  %v324_v21 = vadd.f32 %v320_v19, %v248_v15 }
  0xcb   :  { %v332_v22 = vadd.f32 %v328_v16, %v324_v21  ;;  %v331_v23 = vadd.f32 %v327_v18, %v323_v20 }
  0xcd   :  { %346 = vtanh.f32 %v332_v22 }
  0xce   :  { %348 = vtanh.f32 %v331_v23 }
  0xd3   :  { %v347_v24 = vpop.eup %346 }
  0xd4   :  { %v337_v25 = vrot.slane %v347_v24, 4  ;;  %v349_v26 = vpop.eup %348 }
  0xd6   :  { %v339_v27 = vsel %vm338_vm0, %v349_v26, %v337_v25 }
  0xd7   :  { %341 = vst [vmem:[%s796_s7] sm:$0xff] %v339_v27 }

</bundles_post_ra>
